<compile_context>
chip_gen: v7x
topology: tpu7x:2x2x1
jax: 0.10.0
libtpu: 0.0.40
codegen_flags: <defaults>
</compile_context>

<pallas_src>
import functools

import jax
import jax.numpy as jnp
from jax.experimental import pallas as pl
from jax.experimental.pallas import tpu as pltpu

BLOCK_B = 128   # max batch-tile rows per grid step (v5e-friendly; raiseable on v6e/v7x)
NEG_BIG = -1e30  # softmax mask value baked into padded fc3-bias lanes


def _round_up(n, m):
    return ((n + m - 1) // m) * m


def _pad_feature(n):
    """Pad a feature dim for lane-dense MXU operands.

    <=128: leave as-is (full-dim blocks are legal; Mosaic pads lanes internally,
           so we avoid inflating tiny dims).
    >128:  round to 128/256 multiples (256-wide MXU on v6e/v7x).
    """
    if n <= 128:
        return n
    if n <= 256:
        return _round_up(n, 128)
    return _round_up(n, 256)


# --------------------------------------------------------------------------
# Kernel
# --------------------------------------------------------------------------
def mlp_kernel(x_ref, w1_ref, b1_ref, w2_ref, b2_ref, w3_ref, b3_ref, o_ref):
    # x arrives un-padded / f32; cast to bf16 for the MXU inside the kernel.
    x = x_ref[...].astype(w1_ref.dtype)

    # fc1 + ReLU (f32 accumulation, f32 elementwise)
    h1 = jnp.dot(x, w1_ref[...], preferred_element_type=jnp.float32) + b1_ref[...]
    h1 = jnp.maximum(h1, 0.0)

    # fc2 + ReLU
    h2 = jnp.dot(h1.astype(w2_ref.dtype), w2_ref[...],
                 preferred_element_type=jnp.float32) + b2_ref[...]
    h2 = jnp.maximum(h2, 0.0)

    # fc3 (padded bias lanes are pre-set to -1e30, so no explicit lane mask
    # is needed for the softmax below).
    logits = jnp.dot(h2.astype(w3_ref.dtype), w3_ref[...],
                     preferred_element_type=jnp.float32) + b3_ref[...]

    # Numerically stable softmax with an EXACT divide so rows sum to 1.
    m = jnp.max(logits, axis=-1, keepdims=True)
    e = jnp.exp(logits - m)
    denom = jnp.sum(e, axis=-1, keepdims=True)
    o_ref[...] = (e / denom).astype(o_ref.dtype)


# --------------------------------------------------------------------------
# One-time parameter preparation (off the hot path)
# --------------------------------------------------------------------------
def prepare_params(params):
    """Pad feature dims and cast weights to bf16 ONCE; returns (prepared, out_size)."""
    w1, b1, w2, b2, w3, b3 = params
    in_size, h1 = w1.shape
    h2 = w2.shape[1]
    out = w3.shape[1]
    h1_p, h2_p, out_p = _pad_feature(h1), _pad_feature(h2), _pad_feature(out)

    def pad2(a, rows, cols, fill=0.0):
        buf = jnp.full((rows, cols), fill, a.dtype)
        return buf.at[: a.shape[0], : a.shape[1]].set(a)

    # Weights stored [in, out] (x @ W + b == PyTorch Linear with W_pt = W.T).
    # w1 rows stay at in_size so x needs no lane padding.
    w1p = pad2(w1, in_size, h1_p).astype(jnp.bfloat16)
    w2p = pad2(w2, h1_p, h2_p).astype(jnp.bfloat16)
    w3p = pad2(w3, h2_p, out_p).astype(jnp.bfloat16)
    b1p = pad2(b1.reshape(1, -1), 1, h1_p).astype(jnp.float32)
    b2p = pad2(b2.reshape(1, -1), 1, h2_p).astype(jnp.float32)
    # Bake the softmax lane mask into the padded fc3-bias columns.
    b3p = pad2(b3.reshape(1, -1), 1, out_p, fill=NEG_BIG).astype(jnp.float32)
    return (w1p, b1p, w2p, b2p, w3p, b3p), out


# --------------------------------------------------------------------------
# Forward
# --------------------------------------------------------------------------
@functools.partial(jax.jit, static_argnames=("out_size",))
def simple_mlp_forward(x, prepared, *, out_size):
    w1p, b1p, w2p, b2p, w3p, b3p = prepared
    B, in_size = x.shape
    h1_p = w1p.shape[1]
    h2_p = w2p.shape[1]
    out_p = w3p.shape[1]

    # Balanced batch tiling; >=2 grid steps when B > 16 so both v7x TCs work.
    n_tiles = pl.cdiv(B, BLOCK_B)
    if B > 16:
        n_tiles = max(n_tiles, 2)
    tb = _round_up(pl.cdiv(B, n_tiles), 8)
    b_p = _round_up(B, tb)
    grid = (b_p // tb,)

    # x: pad only the batch axis (if needed); feature dim stays un-inflated.
    xp = x if b_p == B else jnp.pad(x, ((0, b_p - B), (0, 0)))

    # Weights / biases: constant index_map -> VMEM-resident across grid steps.
    def const(shape):
        return pl.BlockSpec(shape, lambda i: (0, 0))

    # VMEM budget: resident weights (default double-buffered) + streamed tiles,
    # with headroom; capped at 64 MiB so it is safe on v7x.
    def nbytes(a):
        return a.size * a.dtype.itemsize

    resident = (nbytes(w1p) + nbytes(w2p) + nbytes(w3p)
                + nbytes(b1p) + nbytes(b2p) + nbytes(b3p))
    streamed = tb * in_size * xp.dtype.itemsize + tb * out_p * 4
    vmem_limit = int(min(max(2 * (resident + streamed) + (8 << 20), 16 << 20),
                         64 << 20))

    flops = 2 * b_p * (in_size * h1_p + h1_p * h2_p + h2_p * out_p)
    bytes_accessed = (nbytes(xp) + resident + b_p * out_p * 4)

    out_padded = pl.pallas_call(
        mlp_kernel,
        out_shape=jax.ShapeDtypeStruct((b_p, out_p), jnp.float32),
        grid=grid,
        in_specs=[
            pl.BlockSpec((tb, in_size), lambda i: (i, 0)),   # x: tiled over batch
            const((in_size, h1_p)), const((1, h1_p)),        # fc1
            const((h1_p, h2_p)), const((1, h2_p)),           # fc2
            const((h2_p, out_p)), const((1, out_p)),         # fc3
        ],
        out_specs=pl.BlockSpec((tb, out_p), lambda i: (i, 0)),
        compiler_params=pltpu.CompilerParams(
            dimension_semantics=("parallel",),
            vmem_limit_bytes=vmem_limit),
        cost_estimate=pl.CostEstimate(
            flops=flops,
            transcendentals=b_p * out_p,
            bytes_accessed=bytes_accessed),
    )(xp, w1p, b1p, w2p, b2p, w3p, b3p)

    # Strip batch / lane padding.
    return out_padded[:B, :out_size]


# --------------------------------------------------------------------------
# Reference / init / test
# --------------------------------------------------------------------------
def mlp_reference(x, params):
    """Pure-JAX reference (f32) matching the PyTorch module semantics."""
    w1, b1, w2, b2, w3, b3 = params
    h1 = jnp.maximum(x @ w1 + b1, 0.0)
    h2 = jnp.maximum(h1 @ w2 + b2, 0.0)
    logits = h2 @ w3 + b3
    return jax.nn.softmax(logits, axis=-1)


def init_params(key, input_size, hidden_size1, hidden_size2, output_size):
    """Deterministic init mimicking nn.Linear's uniform(-1/sqrt(fan_in), ...)."""
    def linear(k, fan_in, fan_out):
        kw, kb = jax.random.split(k)
        bound = 1.0 / jnp.sqrt(fan_in)
        # Stored transposed relative to PyTorch: [in, out] so the kernel does x @ W.
        w = jax.random.uniform(kw, (fan_in, fan_out), jnp.float32, -bound, bound)
        b = jax.random.uniform(kb, (fan_out,), jnp.float32, -bound, bound)
        return w, b

    k1, k2, k3 = jax.random.split(key, 3)
    w1, b1 = linear(k1, input_size, hidden_size1)
    w2, b2 = linear(k2, hidden_size1, hidden_size2)
    w3, b3 = linear(k3, hidden_size2, output_size)
    return (w1, b1, w2, b2, w3, b3)


if __name__ == "__main__":
    # Small, MLP-consistent shapes: x is [batch, input_size]
    batch = 8
    input_size = 32
    hidden_size1 = 64
    hidden_size2 = 48
    output_size = 16

    key = jax.random.PRNGKey(0)
    kx, kp = jax.random.split(key)
    x = jax.random.normal(kx, (batch, input_size), jnp.float32)
    params = init_params(kp, input_size, hidden_size1, hidden_size2, output_size)

    # One-time weight prep (padding + bf16 cast) off the hot path.
    prepared, out_size = prepare_params(params)
    prepared = jax.block_until_ready(prepared)

    out = simple_mlp_forward(x, prepared, out_size=out_size)
    out = jax.block_until_ready(out)

    # sanity: shape, softmax rows sum to 1 (exact divide), matches f32 reference
    ref = mlp_reference(x, params)
    row_sums = jnp.sum(out, axis=-1)
    assert out.shape == (batch, output_size)
    assert jnp.allclose(row_sums, jnp.ones_like(row_sums), atol=1e-3)
    assert jnp.allclose(out, ref, atol=3e-2, rtol=3e-2)  # bf16 MXU operands vs f32 ref

    print("KERNEL_OK")
</pallas_src>

<mosaic_0001>
module attributes {stable_mosaic.version = 11 : i64} {
  func.func @mlp_kernel(%arg0: i32, %arg1: memref<8x32xf32, #tpu.memory_space<vmem>>, %arg2: memref<32x64xbf16, #tpu.memory_space<vmem>>, %arg3: memref<1x64xf32, #tpu.memory_space<vmem>>, %arg4: memref<64x48xbf16, #tpu.memory_space<vmem>>, %arg5: memref<1x48xf32, #tpu.memory_space<vmem>>, %arg6: memref<48x16xbf16, #tpu.memory_space<vmem>>, %arg7: memref<1x16xf32, #tpu.memory_space<vmem>>, %arg8: memref<8x16xf32, #tpu.memory_space<vmem>>) attributes {dimension_semantics = [#tpu.dimension_semantics<parallel>], iteration_bounds = array<i64: 1>, scalar_prefetch = 0 : i64, scratch_operands = 0 : i64, tpu.core_type = #tpu.core_type<tc>, window_params = [{transform_indices = @transform_0, window_bounds = array<i64: 8, 32>}, {pipeline_mode = #tpu.pipeline_mode<synchronous>, transform_indices = @transform_1, window_bounds = array<i64: 32, 64>}, {pipeline_mode = #tpu.pipeline_mode<synchronous>, transform_indices = @transform_2, window_bounds = array<i64: 1, 64>}, {pipeline_mode = #tpu.pipeline_mode<synchronous>, transform_indices = @transform_3, window_bounds = array<i64: 64, 48>}, {pipeline_mode = #tpu.pipeline_mode<synchronous>, transform_indices = @transform_4, window_bounds = array<i64: 1, 48>}, {pipeline_mode = #tpu.pipeline_mode<synchronous>, transform_indices = @transform_5, window_bounds = array<i64: 48, 16>}, {pipeline_mode = #tpu.pipeline_mode<synchronous>, transform_indices = @transform_6, window_bounds = array<i64: 1, 16>}, {transform_indices = @transform_7, window_bounds = array<i64: 8, 16>}]} {
    %c0 = arith.constant 0 : index
    %c0_0 = arith.constant 0 : index
    %0 = vector.load %arg1[%c0, %c0_0] : memref<8x32xf32, #tpu.memory_space<vmem>>, vector<8x32xf32>
    %1 = arith.truncf %0 : vector<8x32xf32> to vector<8x32xbf16>
    %c0_1 = arith.constant 0 : index
    %c0_2 = arith.constant 0 : index
    %2 = vector.load %arg2[%c0_1, %c0_2] : memref<32x64xbf16, #tpu.memory_space<vmem>>, vector<32x64xbf16>
    %cst = arith.constant dense<0.000000e+00> : vector<8x64xf32>
    %3 = tpu.matmul %1, %2, %cst {dimension_numbers = #tpu.dot_dimension_numbers<[1], [0], [0], [1], [0, 0, 1, 1], [], []>} : vector<8x32xbf16>, vector<32x64xbf16>, vector<8x64xf32> -> vector<8x64xf32>
    %c0_3 = arith.constant 0 : index
    %c0_4 = arith.constant 0 : index
    %4 = vector.load %arg3[%c0_3, %c0_4] : memref<1x64xf32, #tpu.memory_space<vmem>>, vector<1x64xf32>
    %5 = vector.broadcast %4 : vector<1x64xf32> to vector<8x64xf32>
    %6 = arith.addf %3, %5 : vector<8x64xf32>
    %cst_5 = arith.constant 0.000000e+00 : f32
    %7 = vector.broadcast %cst_5 : f32 to vector<8x64xf32>
    %8 = arith.maximumf %6, %7 : vector<8x64xf32>
    %9 = arith.truncf %8 : vector<8x64xf32> to vector<8x64xbf16>
    %c0_6 = arith.constant 0 : index
    %c0_7 = arith.constant 0 : index
    %10 = vector.load %arg4[%c0_6, %c0_7] : memref<64x48xbf16, #tpu.memory_space<vmem>>, vector<64x48xbf16>
    %cst_8 = arith.constant dense<0.000000e+00> : vector<8x48xf32>
    %11 = tpu.matmul %9, %10, %cst_8 {dimension_numbers = #tpu.dot_dimension_numbers<[1], [0], [0], [1], [0, 0, 1, 1], [], []>} : vector<8x64xbf16>, vector<64x48xbf16>, vector<8x48xf32> -> vector<8x48xf32>
    %c0_9 = arith.constant 0 : index
    %c0_10 = arith.constant 0 : index
    %12 = vector.load %arg5[%c0_9, %c0_10] : memref<1x48xf32, #tpu.memory_space<vmem>>, vector<1x48xf32>
    %13 = vector.broadcast %12 : vector<1x48xf32> to vector<8x48xf32>
    %14 = arith.addf %11, %13 : vector<8x48xf32>
    %cst_11 = arith.constant 0.000000e+00 : f32
    %15 = vector.broadcast %cst_11 : f32 to vector<8x48xf32>
    %16 = arith.maximumf %14, %15 : vector<8x48xf32>
    %17 = arith.truncf %16 : vector<8x48xf32> to vector<8x48xbf16>
    %c0_12 = arith.constant 0 : index
    %c0_13 = arith.constant 0 : index
    %18 = vector.load %arg6[%c0_12, %c0_13] : memref<48x16xbf16, #tpu.memory_space<vmem>>, vector<48x16xbf16>
    %cst_14 = arith.constant dense<0.000000e+00> : vector<8x16xf32>
    %19 = tpu.matmul %17, %18, %cst_14 {dimension_numbers = #tpu.dot_dimension_numbers<[1], [0], [0], [1], [0, 0, 1, 1], [], []>} : vector<8x48xbf16>, vector<48x16xbf16>, vector<8x16xf32> -> vector<8x16xf32>
    %c0_15 = arith.constant 0 : index
    %c0_16 = arith.constant 0 : index
    %20 = vector.load %arg7[%c0_15, %c0_16] : memref<1x16xf32, #tpu.memory_space<vmem>>, vector<1x16xf32>
    %21 = vector.broadcast %20 : vector<1x16xf32> to vector<8x16xf32>
    %22 = arith.addf %19, %21 : vector<8x16xf32>
    %cst_17 = arith.constant dense<0xFF800000> : vector<8xf32>
    %23 = vector.multi_reduction <maximumf>, %22, %cst_17 [1] : vector<8x16xf32> to vector<8xf32>
    %24 = vector.shape_cast %23 : vector<8xf32> to vector<8x1xf32>
    %25 = vector.broadcast %24 : vector<8x1xf32> to vector<8x16xf32>
    %26 = arith.subf %22, %25 : vector<8x16xf32>
    %27 = math.exp %26 : vector<8x16xf32>
    %cst_18 = arith.constant dense<0.000000e+00> : vector<8xf32>
    %28 = vector.multi_reduction <add>, %27, %cst_18 [1] : vector<8x16xf32> to vector<8xf32>
    %29 = vector.shape_cast %28 : vector<8xf32> to vector<8x1xf32>
    %30 = vector.broadcast %29 : vector<8x1xf32> to vector<8x16xf32>
    %31 = arith.divf %27, %30 : vector<8x16xf32>
    %c0_19 = arith.constant 0 : index
    %c0_20 = arith.constant 0 : index
    %32 = vector.load %arg8[%c0_19, %c0_20] : memref<8x16xf32, #tpu.memory_space<vmem>>, vector<8x16xf32>
    tpu.vector_store %arg8[%c0_19, %c0_20], %31 {strides = array<i32>} : memref<8x16xf32, #tpu.memory_space<vmem>>, vector<8x16xf32>,
    return
  }
  func.func @transform_0(%arg0: i32) -> (i32, i32) {
    %c0_i32 = arith.constant 0 : i32
    %c0_i32_0 = arith.constant 0 : i32
    return %arg0, %c0_i32 : i32, i32
  }
  func.func @transform_1(%arg0: i32) -> (i32, i32) {
    %c0_i32 = arith.constant 0 : i32
    %c0_i32_0 = arith.constant 0 : i32
    %c0_i32_1 = arith.constant 0 : i32
    return %c0_i32, %c0_i32_0 : i32, i32
  }
  func.func @transform_2(%arg0: i32) -> (i32, i32) {
    %c0_i32 = arith.constant 0 : i32
    %c0_i32_0 = arith.constant 0 : i32
    %c0_i32_1 = arith.constant 0 : i32
    return %c0_i32, %c0_i32_0 : i32, i32
  }
  func.func @transform_3(%arg0: i32) -> (i32, i32) {
    %c0_i32 = arith.constant 0 : i32
    %c0_i32_0 = arith.constant 0 : i32
    %c0_i32_1 = arith.constant 0 : i32
    return %c0_i32, %c0_i32_0 : i32, i32
  }
  func.func @transform_4(%arg0: i32) -> (i32, i32) {
    %c0_i32 = arith.constant 0 : i32
    %c0_i32_0 = arith.constant 0 : i32
    %c0_i32_1 = arith.constant 0 : i32
    return %c0_i32, %c0_i32_0 : i32, i32
  }
  func.func @transform_5(%arg0: i32) -> (i32, i32) {
    %c0_i32 = arith.constant 0 : i32
    %c0_i32_0 = arith.constant 0 : i32
    %c0_i32_1 = arith.constant 0 : i32
    return %c0_i32, %c0_i32_0 : i32, i32
  }
  func.func @transform_6(%arg0: i32) -> (i32, i32) {
    %c0_i32 = arith.constant 0 : i32
    %c0_i32_0 = arith.constant 0 : i32
    %c0_i32_1 = arith.constant 0 : i32
    return %c0_i32, %c0_i32_0 : i32, i32
  }
  func.func @transform_7(%arg0: i32) -> (i32, i32) {
    %c0_i32 = arith.constant 0 : i32
    %c0_i32_0 = arith.constant 0 : i32
    return %arg0, %c0_i32 : i32, i32
  }
}

</mosaic_0001>

<bundles_post_ra>
// kernel: simple_mlp_forward.1
= control target key start
LH: loop header
LB: loop body
LE: loop exit
PB: predicated region body
PF: predicated region fallthrough
CT: control target
= control target key end

     0   :  { %v383_v1 = vmov 0.0   ;;  %vm384_vm0 = vmmov 0   ;;  %vm53_vm1 = vcmask 261120   ;;  %s483_s0 = inlined_call_operand.vmem [shape: f32[8,32], index: 0, kind: input, shape index: {}]   ;;  %s484_s1 = inlined_call_operand.vmem [shape: bf16[32,64], index: 1, kind: input, shape index: {}]   ;;  %s485_s2 = inlined_call_operand.vmem [shape: f32[1,64], index: 2, kind: input, shape index: {}]   ;;  %s486_s3 = inlined_call_operand.vmem [shape: bf16[64,48], index: 3, kind: input, shape index: {}]   ;;  %s487_s4 = inlined_call_operand.vmem [shape: f32[1,48], index: 4, kind: input, shape index: {}]   ;;  %s488_s5 = inlined_call_operand.vmem [shape: bf16[48,16], index: 5, kind: input, shape index: {}]   ;;  %s489_s6 = inlined_call_operand.vmem [shape: f32[1,16], index: 6, kind: input, shape index: {}]   ;;  %s490_s7 = inlined_call_operand.hbm [shape: f32[8,16], index: 7, kind: output, shape index: {}]  }
   0x1   :  { %v346_v0 = vld [vmem:[%s484_s1] sm:$0xff]   ;;  %313 = vmatprep.subr.bf16.mxu0 %v383_v1  ;;  %v347_v2 = vld [vmem:[%s484_s1 + $0x8] sm:$0xff]   ;;  %321 = vmatprep.subr.bf16.mxu1 %v383_v1 }
   0x2   :  { %314 = vmatpush3.bf16.msra.mxu0 %v346_v0  ;;  %317 = vmatprep.mubr.msk.bf16.mxu0 %vm384_vm0, %v383_v1  ;;  %v28_v3 = vld [vmem:[%s483_s0] sm:$0xff]  ;;  %v349_v5 = vld [vmem:[%s486_s3 + $0x8] sm:$0xff]  }
   0x3   :  { %315 = vmatprep.subr.bf16.mxu0 %v383_v1  ;;  %v348_v4 = vld [vmem:[%s486_s3] sm:$0xff]   ;;  %329 = vmatprep.mubr.msk.bf16.mxu1 %vm384_vm0, %v383_v1  ;;  %v29_v6 = vpack.c.bf16 %v28_v3, %v28_v3 }
   0x4   :  { %322 = vmatpush3.bf16.msra.mxu1 %v348_v4 }
   0x5   :  { %323 = vmatprep.subr.bf16.mxu1 %v383_v1 }
   0x6   :  { %316 = vmatpush3.bf16.msra.mxu0 %v347_v2 }
   0x7   :  { %333 = vmatprep.subr.bf16.mxu0 %v383_v1 }
   0x8   :  { %12 = vsyncpa [#allocation3], 0  ;;  %324 = vmatpush3.bf16.msra.mxu1 %v349_v5  ;;  %v350_v7 = vld [vmem:[%s486_s3 + $0x10] sm:$0xff]   ;;  %v351_v8 = vld [vmem:[%s486_s3 + $0x18] sm:$0xff]   ;;  %vm138_vm2 = vcmask 523264   ;;  %vm215_vm3 = vcmask 392192  }
   0x9   :  { %318 = vmatmul.mubr.msk.bf16.vlgmr.msra.gmra.mrb[0].mxu0 %vm53_vm1, %v29_v6  ;;  %325 = vmatprep.subr.bf16.mxu1 %v383_v1  ;;  %v352_v9 = vld [vmem:[%s488_s5] sm:$0xff]   ;;  %v353_v18 = vld [vmem:[%s488_s5 + $0x8] sm:$0xff]   ;;  %v354_v19 = vld [vmem:[%s488_s5 + $0x10] sm:$0xff]   ;;  %vm259_vm4 = vcmask 130048  }
   0xa   :  { %339 = vmatprep.mubr.msk.bf16.mxu0 %vm384_vm0, %v383_v1  ;;  %334 = vmatpush3.bf16.msra.mxu0 %v352_v9  ;;  %v286_v10 = vld [vmem:[%s485_s2] ss:$0 sm:$0xff] }
   0xb   :  { %335 = vmatprep.subr.bf16.mxu0 %v383_v1  ;;  %v290_v20 = vld [vmem:[%s487_s4] ss:$0 sm:$0xff]  ;;  %s385_s4 = smov [#allocation2]  }
   0xc   :  { %326 = vmatpush3.bf16.msra.mxu1 %v350_v7  ;;  %v296_v28 = vld [vmem:[%s489_s6] ss:$0 sm:$0xff]  ;;  %s278_s5 = sshll.u32 %s385_s4, 4  ;;  %s279_s5 = int_to_ptr.vmem [resolvable:$true] %s278_s5 }
   0xd   :  { %327 = vmatprep.subr.bf16.mxu1 %v383_v1  ;;  %s359_s6 = scalar_lea.vmem %s279_s5, 128  ;;  %p364_p1 = scmp.lt.s32.totalorder %s279_s5, %s279_s5 }
   0xe   :  { %336 = vmatpush3.bf16.msra.mxu0 %v353_v18  ;;  %p360_p0 = scmp.ne.s32.totalorder %s279_s5, %s359_s6  ;;  %p365_p2 = scmp.lt.s32.totalorder %s359_s6, %s359_s6 }
   0xf   :  { %337 = vmatprep.subr.bf16.mxu0 %v383_v1 }
  0x10   :  { %328 = vmatpush3.bf16.msra.mxu1 %v351_v8  ;;  %p366_p3 = por %p365_p2, %p364_p1 }
  0x12   :  { %338 = vmatpush3.bf16.msra.mxu0 %v354_v19  ;;  %p367_p4 = pnand %p366_p3, %p360_p0 }
  0xdc   :  { %v91_v11 = vpop.f32.mrb[0].mxu0 }
  0xdd   :  { %v92_v12 = vadd.f32 %v286_v10, %v91_v11  ;;  %v319_v13 = vpop.f32.mrb[1].mxu0 }
  0xde   :  { %v94_v14 = vpop.f32.mrb[2].mxu0 }
  0xdf   :  { %v97_v15 = vmax.f32 %v92_v12, 0.0  ;;  %v320_v16 = vpop.f32.mrb[3].mxu0 }
  0xe1   :  { %v98_v17 = vpack.c.bf16 %v97_v15, %v97_v15 }
  0xe3   :  { %330 = vmatmul.mubr.msk.bf16.vlgmr.msra.gmra.mrb[0].mxu1 %vm138_vm2, %v98_v17 }
 0x1b6   :  { %v176_v21 = vpop.f32.mrb[0].mxu1 }
 0x1b7   :  { %v177_v22 = vadd.f32 %v290_v20, %v176_v21  ;;  %v331_v23 = vpop.f32.mrb[1].mxu1 }
 0x1b8   :  { %v179_v24 = vpop.f32.mrb[2].mxu1 }
 0x1b9   :  { %v182_v25 = vmax.f32 %v177_v22, 0.0  ;;  %v332_v26 = vpop.f32.mrb[3].mxu1 }
 0x1bb   :  { %v183_v27 = vpack.c.bf16 %v182_v25, %v182_v25 }
 0x1bd   :  { %340 = vmatmul.mubr.msk.bf16.vlgmr.msra.gmra.mrb[4].mxu0 %vm215_vm3, %v183_v27 }
 0x290   :  { %v253_v29 = vpop.f32.mrb[4].mxu0 }
 0x291   :  { %v254_v30 = vadd.f32 %v296_v28, %v253_v29  ;;  %v341_v31 = vpop.f32.mrb[5].mxu0 }
 0x292   :  { %v256_v32 = vpop.f32.mrb[6].mxu0 }
 0x293   :  { %v342_v33 = vpop.f32.mrb[7].mxu0  ;;  %v260_v34 = vsel %vm259_vm4, %v254_v30, -inf }
 0x294   :  { %261 = vmax.xlane.f32.xlu0 %v260_v34 }
 0x321   :  { %v262_v35 = vpop.xlane.xlu0 %261 }
 0x322   :  { %v263_v36 = vsub.f32 %v254_v30, %v262_v35 }
 0x324   :  { %v264_v37 = vmul.f32 1.442695, %v263_v36 }
 0x326   :  { %355 = vpow2.f32 %v264_v37 }
 0x330   :  { %v356_v38 = vpop.eup %355 }
 0x331   :  { %v266_v39 = vsel %vm259_vm4, %v356_v38, 0.0 }
 0x332   :  { %267 = vadd.xlane.f32.xlu0 %v266_v39 }
 0x3bf   :  { %v268_v40 = vpop.xlane.xlu0 %267 }
 0x3c0   :  { %357 = vrcp.f32 %v268_v40 }
 0x3ca   :  { %v358_v41 = vpop.eup %357 }
 0x3cb   :  { %v270_v42 = vmul.f32 %v358_v41, %v356_v38 }
 0x3cd   :  { %271 = vst.msk [vmem:[#allocation2] sm:$0xff] %vm259_vm4, %v270_v42 }
 0x3ce   :  { %370 = shalt.err (!%p367_p4)
}
 0x3cf   :  { %s371_s25 = scalar_lea.hbm %s490_s7, 128 }
 0x3d0   :  { %p372_p5 = scmp.ne.s32.totalorder %s490_s7, %s371_s25  ;;  %p375_p6 = scmp.lt.u32.totalorder %s371_s25, %s490_s7 }
 0x3d2   :  { %p377_p7 = pnand %p375_p6, %p372_p5 }
 0x3d4   :  { %380 = shalt.err (!%p377_p7)
}
 0x3d5   :  { %281 = dma.vmem_to_hbm [thread:$0]  %s279_s5, 128, %s490_s7, [#allocation3]  }
 0x3d6   :  { %381 = dma.done.wait [#allocation3], 128  }
 0x3d7   :  { %382 = vsyncadd [#allocation3], 4294967168 }
 0x3d8   :  { %285 = vsyncpa [#allocation3], 1 }

</bundles_post_ra>
